<compile_context>
chip_gen: v5e
topology: v5e:2x2
jax: 0.10.0
libtpu: 0.0.40
codegen_flags: <defaults>
</compile_context>

<pallas_src>
import functools

import jax
import jax.numpy as jnp
from jax.experimental import pallas as pl
from jax.experimental.pallas import tpu as pltpu

IN_FEATURES = 784
HID1 = 128
HID2 = 64
LANE = 128


def _round_up(x, m):
    return (x + m - 1) // m * m


def _mlp_kernel(x_ref, w1_ref, b1_ref, w2_ref, b2_ref, wc_ref, bc_ref, hw_ref,
                o_ref, *, x_needs_cast):
    tb = x_ref.shape[0]

    # ---- fc1 (784 -> 128), f32 accumulation on the MXU ----
    if x_needs_cast:
        # x arrived wider than bf16: cast per 128-lane K-chunk so the bf16 copy
        # stays vreg-resident (no materialized (TB, 784) bf16 VMEM copy).
        h1 = jnp.zeros((tb, HID1), jnp.float32)
        for s in range(0, IN_FEATURES, LANE):        # static unroll (7 chunks)
            w = min(LANE, IN_FEATURES - s)
            xs = x_ref[:, s:s + w].astype(jnp.bfloat16)
            h1 = h1 + jnp.dot(xs, w1_ref[s:s + w, :],
                              preferred_element_type=jnp.float32)
    else:
        # x is already bf16: stream it straight into the MXU, no cast at all.
        h1 = jnp.dot(x_ref[...], w1_ref[...], preferred_element_type=jnp.float32)
    h1 = jnp.maximum(h1 + b1_ref[...], 0.0)

    # ---- fc2 + relu (128 -> 64) ----
    h2 = jnp.dot(h1.astype(jnp.bfloat16), w2_ref[...],
                 preferred_element_type=jnp.float32) + b2_ref[...]
    h2 = jnp.maximum(h2, 0.0)

    # ---- collaborative logistic heads (64 -> Hpad) + sigmoid ----
    logits = jnp.dot(h2.astype(jnp.bfloat16), wc_ref[...],
                     preferred_element_type=jnp.float32) + bc_ref[...]
    probs = jax.nn.sigmoid(logits)                     # (TB, Hpad) f32

    # ---- head mean: probs @ hw_col -> (TB, 1) ----
    # hw_col = 1/H for real heads, 0 for lane-padded heads (masks sigmoid(0)).
    o_ref[...] = jnp.dot(probs, hw_ref[...], preferred_element_type=jnp.float32)


def collaborative_simple_mlp(x, params, *, block_batch=4096):
    """x: (..., 784) after flattening (bf16 preferred); returns (batch, 1) f32."""
    w1, b1, w2, b2, wc, bc = params

    # Keep the caller's dtype: bf16 x halves HBM traffic on this read-bound
    # kernel; do NOT astype here (a wrapper cast = extra HBM read+write pass).
    x2d = x.reshape(-1, IN_FEATURES)
    B = x2d.shape[0]
    x_needs_cast = x2d.dtype != jnp.bfloat16
    x_bytes = jnp.dtype(x2d.dtype).itemsize

    n_heads = wc.shape[1]
    h_pad = _round_up(n_heads, LANE)

    # Generation-aware VMEM budget (v5e/v6e: 128 MiB physical, v7x: 64 MiB).
    try:
        vmem_phys = int(pltpu.get_tpu_info().vmem_capacity_bytes)
    except Exception:                                  # conservative fallback
        vmem_phys = 64 * 1024 * 1024
    vmem_limit = min(int(vmem_phys * 0.75), 100 * 1024 * 1024)

    # Cap the batch tile so double-buffered x tiles + f32 intermediates fit.
    per_row_bytes = IN_FEATURES * x_bytes * 2 + 2048
    tb_cap = max(8, (int(0.6 * vmem_limit) // per_row_bytes) // 8 * 8)
    block_batch = min(block_batch, tb_cap)

    # Balanced batch tiles (padding waste < 1 row-group per tile); force >=2
    # (up to 4) tiles at moderate B so v7x's two TensorCores both get work.
    grid_b = max(pl.cdiv(B, block_batch), min(4, pl.cdiv(B, 512)))
    tb = _round_up(pl.cdiv(B, grid_b), 8)
    b_pad = grid_b * tb
    if b_pad != B:
        x2d = jnp.pad(x2d, ((0, b_pad - B), (0, 0)))

    # Weights prepacked as bf16 MXU operands; biases stay f32.
    w1b = w1.astype(jnp.bfloat16)
    w2b = w2.astype(jnp.bfloat16)
    wcb = jnp.pad(wc, ((0, 0), (0, h_pad - n_heads))).astype(jnp.bfloat16)
    b1r = b1.reshape(1, HID1).astype(jnp.float32)
    b2r = b2.reshape(1, HID2).astype(jnp.float32)
    bcr = jnp.pad(bc.reshape(1, n_heads).astype(jnp.float32),
                  ((0, 0), (0, h_pad - n_heads)))
    # Head-averaging column: 1/H for real heads, 0 for lane padding.
    hw = jnp.pad(jnp.full((n_heads, 1), 1.0 / n_heads, jnp.float32),
                 ((0, h_pad - n_heads), (0, 0)))

    # VMEM-resident operands (same block every grid step -> fetched once).
    resident = lambda shape: pl.BlockSpec(shape, lambda i: (0,) * len(shape))

    flops = 2 * b_pad * (IN_FEATURES * HID1 + HID1 * HID2 + HID2 * h_pad + h_pad)
    bytes_accessed = (b_pad * IN_FEATURES * x_bytes                     # x
                      + (IN_FEATURES * HID1 + HID1 * HID2 + HID2 * h_pad) * 2
                      + (HID1 + HID2 + h_pad) * 4 + h_pad * 4           # biases+hw
                      + b_pad * 4)                                      # output

    kernel = functools.partial(_mlp_kernel, x_needs_cast=x_needs_cast)

    out = pl.pallas_call(
        kernel,
        out_shape=jax.ShapeDtypeStruct((b_pad, 1), jnp.float32),
        grid=(grid_b,),
        in_specs=[
            pl.BlockSpec((tb, IN_FEATURES), lambda i: (i, 0)),  # x: streamed
            resident((IN_FEATURES, HID1)),                       # w1 (bf16)
            resident((1, HID1)),                                 # b1
            resident((HID1, HID2)),                              # w2 (bf16)
            resident((1, HID2)),                                 # b2
            resident((HID2, h_pad)),                             # wc (bf16)
            resident((1, h_pad)),                                # bc
            resident((h_pad, 1)),                                # head-mean col
        ],
        out_specs=pl.BlockSpec((tb, 1), lambda i: (i, 0)),
        compiler_params=pltpu.CompilerParams(
            dimension_semantics=("parallel",),   # v7x: shard batch over 2 TCs
            vmem_limit_bytes=vmem_limit,
        ),
        cost_estimate=pl.CostEstimate(
            flops=flops,
            transcendentals=b_pad * h_pad,
            bytes_accessed=bytes_accessed,
        ),
    )(x2d, w1b, b1r, w2b, b2r, wcb, bcr, hw)

    return out[:B]


def init_params(key, num_classifiers=7):
    """Deterministic init, PyTorch-Linear-style uniform(-1/sqrt(fan_in), +)."""
    ks = jax.random.split(key, 6)

    def lin(kw, kb, fan_in, fan_out):
        bound = 1.0 / (fan_in ** 0.5)
        w = jax.random.uniform(kw, (fan_in, fan_out), jnp.float32, -bound, bound)
        b = jax.random.uniform(kb, (fan_out,), jnp.float32, -bound, bound)
        return w, b

    w1, b1 = lin(ks[0], ks[1], IN_FEATURES, HID1)
    w2, b2 = lin(ks[2], ks[3], HID1, HID2)
    # num_classifiers independent Linear(64, 1) heads packed as one (64, H) matrix.
    wc, bc = lin(ks[4], ks[5], HID2, num_classifiers)
    return (w1, b1, w2, b2, wc, bc)


def reference_forward(x, params):
    """Pure-JAX f32 reference (mirrors the PyTorch forward)."""
    w1, b1, w2, b2, wc, bc = params
    x = x.reshape(-1, IN_FEATURES).astype(jnp.float32)
    x = jnp.maximum(x @ w1 + b1, 0.0)
    x = jnp.maximum(x @ w2 + b2, 0.0)
    probs = jax.nn.sigmoid(x @ wc + bc)
    return jnp.mean(probs, axis=-1, keepdims=True)


if __name__ == "__main__":
    key = jax.random.PRNGKey(0)
    k_param, k_x = jax.random.split(key)

    params = init_params(k_param, num_classifiers=7)
    # MNIST-like NCHW input: (batch=8, channels=1, 28, 28) -> view(-1, 784)
    x_f32 = jax.random.normal(k_x, (8, 1, 28, 28), dtype=jnp.float32)
    # Preferred producer-side layout: bf16 (halves x HBM bytes in the kernel).
    x_bf16 = x_f32.astype(jnp.bfloat16)

    ref = reference_forward(x_f32, params)

    # Fast path: bf16 x streamed straight into the MXU (no in-kernel cast).
    out_bf16 = jax.block_until_ready(collaborative_simple_mlp(x_bf16, params))
    # Fallback path: f32 x with chunked in-kernel bf16 cast.
    out_f32 = jax.block_until_ready(collaborative_simple_mlp(x_f32, params))

    assert out_bf16.shape == (8, 1), out_bf16.shape
    assert out_f32.shape == (8, 1), out_f32.shape
    # bf16 MXU operands with f32 accumulation -> relaxed tolerance vs f32 ref.
    assert jnp.allclose(out_f32, ref, atol=2e-2, rtol=2e-2), "f32-x path mismatch"
    assert jnp.allclose(out_bf16, ref, atol=2e-2, rtol=2e-2), "bf16-x path mismatch"

    print("KERNEL_OK")
</pallas_src>

<mosaic_0001>
module attributes {stable_mosaic.version = 11 : i64} {
  func.func @_mlp_kernel(%arg0: i32, %arg1: memref<8x784xbf16, #tpu.memory_space<vmem>>, %arg2: memref<784x128xbf16, #tpu.memory_space<vmem>>, %arg3: memref<1x128xf32, #tpu.memory_space<vmem>>, %arg4: memref<128x64xbf16, #tpu.memory_space<vmem>>, %arg5: memref<1x64xf32, #tpu.memory_space<vmem>>, %arg6: memref<64x128xbf16, #tpu.memory_space<vmem>>, %arg7: memref<1x128xf32, #tpu.memory_space<vmem>>, %arg8: memref<128x1xf32, #tpu.memory_space<vmem>>, %arg9: memref<8x1xf32, #tpu.memory_space<vmem>>) attributes {dimension_semantics = [#tpu.dimension_semantics<parallel>], iteration_bounds = array<i64: 1>, scalar_prefetch = 0 : i64, scratch_operands = 0 : i64, tpu.core_type = #tpu.core_type<tc>, window_params = [{transform_indices = @transform_0, window_bounds = array<i64: 8, 784>}, {pipeline_mode = #tpu.pipeline_mode<synchronous>, transform_indices = @transform_1, window_bounds = array<i64: 784, 128>}, {pipeline_mode = #tpu.pipeline_mode<synchronous>, transform_indices = @transform_2, window_bounds = array<i64: 1, 128>}, {pipeline_mode = #tpu.pipeline_mode<synchronous>, transform_indices = @transform_3, window_bounds = array<i64: 128, 64>}, {pipeline_mode = #tpu.pipeline_mode<synchronous>, transform_indices = @transform_4, window_bounds = array<i64: 1, 64>}, {pipeline_mode = #tpu.pipeline_mode<synchronous>, transform_indices = @transform_5, window_bounds = array<i64: 64, 128>}, {pipeline_mode = #tpu.pipeline_mode<synchronous>, transform_indices = @transform_6, window_bounds = array<i64: 1, 128>}, {pipeline_mode = #tpu.pipeline_mode<synchronous>, transform_indices = @transform_7, window_bounds = array<i64: 128, 1>}, {transform_indices = @transform_8, window_bounds = array<i64: 8, 1>}]} {
    %c0 = arith.constant 0 : index
    %c0_0 = arith.constant 0 : index
    %0 = vector.load %arg1[%c0, %c0_0] : memref<8x784xbf16, #tpu.memory_space<vmem>>, vector<8x784xbf16>
    %c0_1 = arith.constant 0 : index
    %c0_2 = arith.constant 0 : index
    %1 = vector.load %arg2[%c0_1, %c0_2] : memref<784x128xbf16, #tpu.memory_space<vmem>>, vector<784x128xbf16>
    %cst = arith.constant dense<0.000000e+00> : vector<8x128xf32>
    %2 = tpu.matmul %0, %1, %cst {dimension_numbers = #tpu.dot_dimension_numbers<[1], [0], [0], [1], [0, 0, 1, 1], [], []>} : vector<8x784xbf16>, vector<784x128xbf16>, vector<8x128xf32> -> vector<8x128xf32>
    %c0_3 = arith.constant 0 : index
    %c0_4 = arith.constant 0 : index
    %3 = vector.load %arg3[%c0_3, %c0_4] : memref<1x128xf32, #tpu.memory_space<vmem>>, vector<1x128xf32>
    %4 = vector.broadcast %3 : vector<1x128xf32> to vector<8x128xf32>
    %5 = arith.addf %2, %4 : vector<8x128xf32>
    %cst_5 = arith.constant 0.000000e+00 : f32
    %6 = vector.broadcast %cst_5 : f32 to vector<8x128xf32>
    %7 = arith.maximumf %5, %6 : vector<8x128xf32>
    %8 = arith.truncf %7 : vector<8x128xf32> to vector<8x128xbf16>
    %c0_6 = arith.constant 0 : index
    %c0_7 = arith.constant 0 : index
    %9 = vector.load %arg4[%c0_6, %c0_7] : memref<128x64xbf16, #tpu.memory_space<vmem>>, vector<128x64xbf16>
    %cst_8 = arith.constant dense<0.000000e+00> : vector<8x64xf32>
    %10 = tpu.matmul %8, %9, %cst_8 {dimension_numbers = #tpu.dot_dimension_numbers<[1], [0], [0], [1], [0, 0, 1, 1], [], []>} : vector<8x128xbf16>, vector<128x64xbf16>, vector<8x64xf32> -> vector<8x64xf32>
    %c0_9 = arith.constant 0 : index
    %c0_10 = arith.constant 0 : index
    %11 = vector.load %arg5[%c0_9, %c0_10] : memref<1x64xf32, #tpu.memory_space<vmem>>, vector<1x64xf32>
    %12 = vector.broadcast %11 : vector<1x64xf32> to vector<8x64xf32>
    %13 = arith.addf %10, %12 : vector<8x64xf32>
    %cst_11 = arith.constant 0.000000e+00 : f32
    %14 = vector.broadcast %cst_11 : f32 to vector<8x64xf32>
    %15 = arith.maximumf %13, %14 : vector<8x64xf32>
    %16 = arith.truncf %15 : vector<8x64xf32> to vector<8x64xbf16>
    %c0_12 = arith.constant 0 : index
    %c0_13 = arith.constant 0 : index
    %17 = vector.load %arg6[%c0_12, %c0_13] : memref<64x128xbf16, #tpu.memory_space<vmem>>, vector<64x128xbf16>
    %cst_14 = arith.constant dense<0.000000e+00> : vector<8x128xf32>
    %18 = tpu.matmul %16, %17, %cst_14 {dimension_numbers = #tpu.dot_dimension_numbers<[1], [0], [0], [1], [0, 0, 1, 1], [], []>} : vector<8x64xbf16>, vector<64x128xbf16>, vector<8x128xf32> -> vector<8x128xf32>
    %c0_15 = arith.constant 0 : index
    %c0_16 = arith.constant 0 : index
    %19 = vector.load %arg7[%c0_15, %c0_16] : memref<1x128xf32, #tpu.memory_space<vmem>>, vector<1x128xf32>
    %20 = vector.broadcast %19 : vector<1x128xf32> to vector<8x128xf32>
    %21 = arith.addf %18, %20 : vector<8x128xf32>
    %22 = arith.negf %21 : vector<8x128xf32>
    %23 = math.exp %22 : vector<8x128xf32>
    %cst_17 = arith.constant 1.000000e+00 : f32
    %24 = vector.broadcast %cst_17 : f32 to vector<8x128xf32>
    %25 = arith.addf %24, %23 : vector<8x128xf32>
    %26 = arith.divf %24, %25 : vector<8x128xf32>
    %c0_18 = arith.constant 0 : index
    %c0_19 = arith.constant 0 : index
    %27 = vector.load %arg8[%c0_18, %c0_19] : memref<128x1xf32, #tpu.memory_space<vmem>>, vector<128x1xf32>
    %cst_20 = arith.constant dense<0.000000e+00> : vector<8x1xf32>
    %28 = tpu.matmul %26, %27, %cst_20 {dimension_numbers = #tpu.dot_dimension_numbers<[1], [0], [0], [1], [0, 0, 1, 1], [], []>} : vector<8x128xf32>, vector<128x1xf32>, vector<8x1xf32> -> vector<8x1xf32>
    %c0_21 = arith.constant 0 : index
    %c0_22 = arith.constant 0 : index
    %29 = vector.load %arg9[%c0_21, %c0_22] : memref<8x1xf32, #tpu.memory_space<vmem>>, vector<8x1xf32>
    tpu.vector_store %arg9[%c0_21, %c0_22], %28 {strides = array<i32>} : memref<8x1xf32, #tpu.memory_space<vmem>>, vector<8x1xf32>,
    return
  }
  func.func @transform_0(%arg0: i32) -> (i32, i32) {
    %c0_i32 = arith.constant 0 : i32
    %c0_i32_0 = arith.constant 0 : i32
    return %arg0, %c0_i32 : i32, i32
  }
  func.func @transform_1(%arg0: i32) -> (i32, i32) {
    %c0_i32 = arith.constant 0 : i32
    %c0_i32_0 = arith.constant 0 : i32
    %c0_i32_1 = arith.constant 0 : i32
    return %c0_i32, %c0_i32_0 : i32, i32
  }
  func.func @transform_2(%arg0: i32) -> (i32, i32) {
    %c0_i32 = arith.constant 0 : i32
    %c0_i32_0 = arith.constant 0 : i32
    %c0_i32_1 = arith.constant 0 : i32
    return %c0_i32, %c0_i32_0 : i32, i32
  }
  func.func @transform_3(%arg0: i32) -> (i32, i32) {
    %c0_i32 = arith.constant 0 : i32
    %c0_i32_0 = arith.constant 0 : i32
    %c0_i32_1 = arith.constant 0 : i32
    return %c0_i32, %c0_i32_0 : i32, i32
  }
  func.func @transform_4(%arg0: i32) -> (i32, i32) {
    %c0_i32 = arith.constant 0 : i32
    %c0_i32_0 = arith.constant 0 : i32
    %c0_i32_1 = arith.constant 0 : i32
    return %c0_i32, %c0_i32_0 : i32, i32
  }
  func.func @transform_5(%arg0: i32) -> (i32, i32) {
    %c0_i32 = arith.constant 0 : i32
    %c0_i32_0 = arith.constant 0 : i32
    %c0_i32_1 = arith.constant 0 : i32
    return %c0_i32, %c0_i32_0 : i32, i32
  }
  func.func @transform_6(%arg0: i32) -> (i32, i32) {
    %c0_i32 = arith.constant 0 : i32
    %c0_i32_0 = arith.constant 0 : i32
    %c0_i32_1 = arith.constant 0 : i32
    return %c0_i32, %c0_i32_0 : i32, i32
  }
  func.func @transform_7(%arg0: i32) -> (i32, i32) {
    %c0_i32 = arith.constant 0 : i32
    %c0_i32_0 = arith.constant 0 : i32
    %c0_i32_1 = arith.constant 0 : i32
    return %c0_i32, %c0_i32_0 : i32, i32
  }
  func.func @transform_8(%arg0: i32) -> (i32, i32) {
    %c0_i32 = arith.constant 0 : i32
    %c0_i32_0 = arith.constant 0 : i32
    return %arg0, %c0_i32 : i32, i32
  }
}

</mosaic_0001>

<bundles_post_ra>
// kernel: tpu_custom_call.1
= control target key start
LH: loop header
LB: loop body
LE: loop exit
PB: predicated region body
PF: predicated region fallthrough
CT: control target
= control target key end

     0   :  { %13 = vsyncpa [#allocation3], 0  ;;  %s1109_s30 = smov [#allocation2]   ;;  %s1110_s10 = smov 64   ;;  %s1268_s0 = inlined_call_operand.vmem [shape: bf16[8,784], index: 0, kind: input, shape index: {}]   ;;  %s1269_s1 = inlined_call_operand.hbm [shape: bf16[784,128], index: 1, kind: input, shape index: {}]   ;;  %s1270_s2 = inlined_call_operand.vmem [shape: f32[1,128], index: 2, kind: input, shape index: {}]   ;;  %s1271_s3 = inlined_call_operand.vmem [shape: bf16[128,64], index: 3, kind: input, shape index: {}]   ;;  %s1272_s4 = inlined_call_operand.vmem [shape: f32[1,64], index: 4, kind: input, shape index: {}]   ;;  %s1273_s5 = inlined_call_operand.vmem [shape: bf16[64,128], index: 5, kind: input, shape index: {}]   ;;  %s1274_s6 = inlined_call_operand.vmem [shape: f32[1,128], index: 6, kind: input, shape index: {}]   ;;  %s1275_s7 = inlined_call_operand.vmem [shape: f32[128,1], index: 7, kind: input, shape index: {}]   ;;  %s1276_s8 = inlined_call_operand.vmem [shape: f32[8,1], index: 8, kind: output, shape index: {}]  }
   0x1   :  { %s20_s29 = sshll.u32 %s1269_s1, 4  ;;  %s22_s9 = sshll.u32 %s1109_s30, 4  ;;  %s21_s29 = int_to_ptr.hbm [resolvable:$true] %s20_s29  ;;  %s23_s9 = int_to_ptr.vmem [resolvable:$true] %s22_s9 }
   0x2   :  { %s1111_s11 = smov 4  }
   0x3   :  { %28 = dma.hbm_to_vmem [thread:$0]  %s21_s29, 6272, %s23_s9, [#allocation3], %s1110_s10, %s1110_s10, %s1111_s11  }
   0x4   :  { %1107 = dma.done.wait [#allocation3], 6272  }
   0x5   :  { %1108 = vsyncadd [#allocation3], 4294961024  ;;  %v1019_v0 = vld [vmem:[#allocation2 + $0x38] sm:$0xff]  ;;  %v1018_v3 = vld [vmem:[#allocation2 + $0x30] sm:$0xff]  ;;  %vm470_vm0 = vcmask 130048   ;;  %vm686_vm1 = vcmask 523264  }
   0x6   :  { %v1027_v1 = vld [vmem:[#allocation2 + $0x78] sm:$0xff]  ;;  %474 = vmatpush.bf16.msra.mxu0 %v1019_v0  ;;  %v1026_v4 = vld [vmem:[#allocation2 + $0x70] sm:$0xff]  ;;  %v1017_v8 = vld [vmem:[#allocation2 + $0x28] sm:$0xff]  ;;  %vm758_vm6 = vcmask 7168  }
   0x7   :  { %v1035_v2 = vld [vmem:[#allocation2 + $0xb8] sm:$0xff]  ;;  %487 = vmatpush.bf16.msra.mxu1 %v1027_v1  ;;  %v1034_v5 = vld [vmem:[#allocation2 + $0xb0] sm:$0xff]  ;;  %v1025_v9 = vld [vmem:[#allocation2 + $0x68] sm:$0xff] }
   0x8   :  { %500 = vmatpush.bf16.msra.mxu2 %v1035_v2  ;;  %v1043_v6 = vld [vmem:[#allocation2 + $0xf8] sm:$0xff]  ;;  %v1042_v7 = vld [vmem:[#allocation2 + $0xf0] sm:$0xff]  ;;  %v1033_v10 = vld [vmem:[#allocation2 + $0xa8] sm:$0xff] }
   0x9   :  { %513 = vmatpush.bf16.msra.mxu3 %v1043_v6  ;;  %v1041_v11 = vld [vmem:[#allocation2 + $0xe8] sm:$0xff]  ;;  %v1016_v12 = vld [vmem:[#allocation2 + $0x20] sm:$0xff]  ;;  %v1015_v16 = vld [vmem:[#allocation2 + $0x18] sm:$0xff] }
   0xa   :  { %475 = vmatpush.bf16.msra.mxu0 %v1018_v3  ;;  %v1024_v13 = vld [vmem:[#allocation2 + $0x60] sm:$0xff]  ;;  %v1023_v17 = vld [vmem:[#allocation2 + $0x58] sm:$0xff]  ;;  %v1014_v20 = vld [vmem:[#allocation2 + $0x10] sm:$0xff] }
   0xb   :  { %488 = vmatpush.bf16.msra.mxu1 %v1026_v4  ;;  %v1032_v14 = vld [vmem:[#allocation2 + $0xa0] sm:$0xff]  ;;  %v1031_v18 = vld [vmem:[#allocation2 + $0x98] sm:$0xff]  ;;  %v1022_v21 = vld [vmem:[#allocation2 + $0x50] sm:$0xff] }
   0xc   :  { %501 = vmatpush.bf16.msra.mxu2 %v1034_v5  ;;  %v1040_v15 = vld [vmem:[#allocation2 + $0xe0] sm:$0xff]  ;;  %v1039_v19 = vld [vmem:[#allocation2 + $0xd8] sm:$0xff]  ;;  %v1030_v22 = vld [vmem:[#allocation2 + $0x90] sm:$0xff] }
   0xd   :  { %514 = vmatpush.bf16.msra.mxu3 %v1042_v7  ;;  %v1038_v23 = vld [vmem:[#allocation2 + $0xd0] sm:$0xff]  ;;  %v1013_v24 = vld [vmem:[#allocation2 + $0x8] sm:$0xff]  ;;  %v46_v26 = vld [vmem:[%s1268_s0] sm:$0xff] }
   0xe   :  { %476 = vmatpush.bf16.msra.mxu0 %v1017_v8  ;;  %v1021_v25 = vld [vmem:[#allocation2 + $0x48] sm:$0xff]  ;;  %v156_v29 = vunpack.c.l.b16 %v46_v26  ;;  %v157_v31 = vunpack.c.h.b16 %v46_v26  ;;  %v1012_v32 = vld [vmem:[#allocation2] sm:$0xff]  ;;  %v1051_v34 = vld [vmem:[#allocation2 + $0x138] sm:$0xff] }
   0xf   :  { %489 = vmatpush.bf16.msra.mxu1 %v1025_v9  ;;  %v1029_v27 = vld [vmem:[#allocation2 + $0x88] sm:$0xff]  ;;  %v1020_v33 = vld [vmem:[#allocation2 + $0x40] sm:$0xff]  ;;  %v1059_v35 = vld [vmem:[#allocation2 + $0x178] sm:$0xff] }
  0x10   :  { %502 = vmatpush.bf16.msra.mxu2 %v1033_v10  ;;  %v47_v28 = vld [vmem:[%s1268_s0 + $0x8] sm:$0xff]  ;;  %v1028_v36 = vld [vmem:[#allocation2 + $0x80] sm:$0xff]  ;;  %v163_v38 = vpack.c.b16 %v156_v29, %v156_v29  ;;  %v164_v39 = vpack.c.b16 %v157_v31, %v157_v31  ;;  %v1050_v43 = vld [vmem:[#allocation2 + $0x130] sm:$0xff] }
  0x11   :  { %515 = vmatpush.bf16.msra.mxu3 %v1041_v11  ;;  %v1037_v30 = vld [vmem:[#allocation2 + $0xc8] sm:$0xff]  ;;  %v158_v37 = vunpack.c.l.b16 %v47_v28  ;;  %v159_v40 = vunpack.c.h.b16 %v47_v28  ;;  %v1036_v41 = vld [vmem:[#allocation2 + $0xc0] sm:$0xff]  ;;  %v1058_v44 = vld [vmem:[#allocation2 + $0x170] sm:$0xff] }
  0x12   :  { %477 = vmatpush.bf16.msra.mxu0 %v1016_v12  ;;  %v1060_v42 = vld [vmem:[#allocation2 + $0x180] sm:$0xff]  ;;  %v1049_v47 = vld [vmem:[#allocation2 + $0x128] sm:$0xff]  ;;  %v49_v51 = vld [vmem:[%s1268_s0 + $0x18] sm:$0xf] }
  0x13   :  { %490 = vmatpush.bf16.msra.mxu1 %v1024_v13  ;;  %v165_v45 = vpack.c.b16 %v158_v37, %v158_v37  ;;  %v166_v46 = vpack.c.b16 %v159_v40, %v159_v40  ;;  %v1057_v48 = vld [vmem:[#allocation2 + $0x168] sm:$0xff]  ;;  %v1048_v49 = vld [vmem:[#allocation2 + $0x120] sm:$0xff]  ;;  %v1047_v52 = vld [vmem:[#allocation2 + $0x118] sm:$0xff]  ;;  %v162_v54 = vunpack.c.l.b16 %v49_v51 }
  0x14   :  { %503 = vmatpush.bf16.msra.mxu2 %v1032_v14  ;;  %v1056_v50 = vld [vmem:[#allocation2 + $0x160] sm:$0xff]  ;;  %v1055_v53 = vld [vmem:[#allocation2 + $0x158] sm:$0xff]  ;;  %v1046_v55 = vld [vmem:[#allocation2 + $0x110] sm:$0xff] }
  0x15   :  { %516 = vmatpush.bf16.msra.mxu3 %v1040_v15  ;;  %v1054_v56 = vld [vmem:[#allocation2 + $0x150] sm:$0xff]  ;;  %v169_v57 = vpack.c.b16 %v162_v54, %v162_v54  ;;  %v1045_v58 = vld [vmem:[#allocation2 + $0x108] sm:$0xff]  ;;  %v1044_v63 = vld [vmem:[#allocation2 + $0x100] sm:$0xff] }
  0x16   :  { %478 = vmatpush.bf16.msra.mxu0 %v1015_v16  ;;  %v1053_v59 = vld [vmem:[#allocation2 + $0x148] sm:$0xff]  ;;  %v48_v60 = vld [vmem:[%s1268_s0 + $0x10] sm:$0xff]  ;;  %v1052_v0 = vld [vmem:[#allocation2 + $0x140] sm:$0xff] }
  0x17   :  { %491 = vmatpush.bf16.msra.mxu1 %v1023_v17  ;;  %v160_v61 = vunpack.c.l.b16 %v48_v60  ;;  %v161_v62 = vunpack.c.h.b16 %v48_v60  ;;  %v1068_v3 = vld [vmem:[%s1271_s3 + $0x38] sm:$0xff]  ;;  %v1067_v4 = vld [vmem:[%s1271_s3 + $0x30] sm:$0xff]  ;;  %v1066_v5 = vld [vmem:[%s1271_s3 + $0x28] sm:$0xff] }
  0x18   :  { %504 = vmatpush.bf16.msra.mxu2 %v1031_v18  ;;  %v1065_v6 = vld [vmem:[%s1271_s3 + $0x20] sm:$0xff]  ;;  %v1064_v7 = vld [vmem:[%s1271_s3 + $0x18] sm:$0xff]  ;;  %v1063_v8 = vld [vmem:[%s1271_s3 + $0x10] sm:$0xff] }
  0x19   :  { %517 = vmatpush.bf16.msra.mxu3 %v1039_v19  ;;  %v167_v1 = vpack.c.b16 %v160_v61, %v160_v61  ;;  %v168_v2 = vpack.c.b16 %v161_v62, %v161_v62  ;;  %v1062_v9 = vld [vmem:[%s1271_s3 + $0x8] sm:$0xff]  ;;  %v1061_v12 = vld [vmem:[%s1271_s3] sm:$0xff]  ;;  %v1072_v15 = vld [vmem:[%s1273_s5 + $0x18] sm:$0xff] }
  0x1a   :  { %479 = vmatpush.bf16.msra.mxu0 %v1014_v20  ;;  %v1071_v18 = vld [vmem:[%s1273_s5 + $0x10] sm:$0xff]  ;;  %v1076_v19 = vld [vmem:[%s1270_s2] ss:$0 sm:$0xff]  ;;  %v1070_v20 = vld [vmem:[%s1273_s5 + $0x8] sm:$0xff] }
  0x1b   :  { %492 = vmatpush.bf16.msra.mxu1 %v1022_v21  ;;  %v731_v51 = vld [vmem:[%s1275_s7 + $0x48] sm:$0xff]  ;;  %v728_v54 = vld [vmem:[%s1275_s7 + $0x30] sm:$0xff]  ;;  %v722_v60 = vld [vmem:[%s1275_s7] sm:$0xff] }
  0x1c   :  { %505 = vmatpush.bf16.msra.mxu2 %v1030_v22  ;;  %v1078_v61 = vld [vmem:[%s1274_s6] ss:$0 sm:$0xff] }
  0x1d   :  { %518 = vmatpush.bf16.msra.mxu3 %v1038_v23 }
  0x1e   :  { %480 = vmatpush.bf16.msra.mxu0 %v1013_v24 }
  0x1f   :  { %493 = vmatpush.bf16.msra.mxu1 %v1021_v25 }
  0x20   :  { %506 = vmatpush.bf16.msra.mxu2 %v1029_v27 }
  0x21   :  { %519 = vmatpush.bf16.msra.mxu3 %v1037_v30 }
  0x22   :  { %481 = vmatpush.bf16.msra.mxu0 %v1012_v32 }
  0x23   :  { %494 = vmatpush.bf16.msra.mxu1 %v1020_v33 }
  0x24   :  { %507 = vmatpush.bf16.msra.mxu2 %v1028_v36 }
  0x25   :  { %482 = vmatmul.bf16.vlgmr.msra.gmra.mxu0 %v163_v38  ;;  %520 = vmatpush.bf16.msra.mxu3 %v1036_v41  ;;  %v1069_v38 = vld [vmem:[%s1273_s5] sm:$0xff] }
  0x26   :  { %526 = vmatpush.bf16.msrb.mxu0 %v1051_v34  ;;  %495 = vmatmul.bf16.vlgmr.msra.gmra.mxu1 %v164_v39  ;;  %v1077_v39 = vld [vmem:[%s1272_s4] ss:$0 sm:$0xff] }
  0x27   :  { %539 = vmatpush.bf16.msrb.mxu1 %v1059_v35  ;;  %508 = vmatmul.bf16.vlgmr.msra.gmra.mxu2 %v165_v45  ;;  %v737_v45 = vld [vmem:[%s1275_s7 + $0x78] sm:$0xff] }
  0x28   :  { %559 = vmatpush.bf16.msrb.mxu2 %v1060_v42  ;;  %521 = vmatmul.bf16.vlgmr.msra.gmra.mxu3 %v166_v46  ;;  %v736_v46 = vld [vmem:[%s1275_s7 + $0x70] sm:$0xff] }
  0x29   :  { %635 = vmatpush.bf16.msrb.mxu3 %v1068_v3 }
  0x2a   :  { %527 = vmatpush.bf16.msrb.mxu0 %v1050_v43 }
  0x2b   :  { %540 = vmatpush.bf16.msrb.mxu1 %v1058_v44 }
  0x2c   :  { %694 = vmatpush.bf16.msra.mxu2 %v1072_v15 }
  0x2d   :  { %636 = vmatpush.bf16.msrb.mxu3 %v1067_v4 }
  0x2e   :  { %528 = vmatpush.bf16.msrb.mxu0 %v1049_v47  ;;  %v735_v47 = vld [vmem:[%s1275_s7 + $0x68] sm:$0xff] }
  0x2f   :  { %541 = vmatpush.bf16.msrb.mxu1 %v1057_v48  ;;  %v734_v48 = vld [vmem:[%s1275_s7 + $0x60] sm:$0xff] }
  0x30   :  { %695 = vmatpush.bf16.msra.mxu2 %v1071_v18 }
  0x31   :  { %637 = vmatpush.bf16.msrb.mxu3 %v1066_v5 }
  0x32   :  { %529 = vmatpush.bf16.msrb.mxu0 %v1048_v49  ;;  %v733_v49 = vld [vmem:[%s1275_s7 + $0x58] sm:$0xff] }
  0x33   :  { %542 = vmatpush.bf16.msrb.mxu1 %v1056_v50  ;;  %v732_v50 = vld [vmem:[%s1275_s7 + $0x50] sm:$0xff] }
  0x34   :  { %696 = vmatpush.bf16.msra.mxu2 %v1070_v20 }
  0x35   :  { %638 = vmatpush.bf16.msrb.mxu3 %v1065_v6 }
  0x36   :  { %530 = vmatpush.bf16.msrb.mxu0 %v1047_v52  ;;  %v730_v52 = vld [vmem:[%s1275_s7 + $0x40] sm:$0xff] }
  0x37   :  { %543 = vmatpush.bf16.msrb.mxu1 %v1055_v53  ;;  %961 = vmatmul.msk.bf16.vlgmr.msrb.gmra.mxu2 %vm470_vm0, %v169_v57  ;;  %v729_v53 = vld [vmem:[%s1275_s7 + $0x38] sm:$0xff] }
  0x38   :  { %697 = vmatpush.bf16.msra.mxu2 %v1069_v38  ;;  %v725_v57 = vld [vmem:[%s1275_s7 + $0x18] sm:$0xff] }
  0x39   :  { %639 = vmatpush.bf16.msrb.mxu3 %v1064_v7 }
  0x3a   :  { %531 = vmatpush.bf16.msrb.mxu0 %v1046_v55  ;;  %v727_v55 = vld [vmem:[%s1275_s7 + $0x28] sm:$0xff] }
  0x3b   :  { %544 = vmatpush.bf16.msrb.mxu1 %v1054_v56  ;;  %v726_v56 = vld [vmem:[%s1275_s7 + $0x20] sm:$0xff] }
  0x3d   :  { %640 = vmatpush.bf16.msrb.mxu3 %v1063_v8 }
  0x3e   :  { %532 = vmatpush.bf16.msrb.mxu0 %v1045_v58  ;;  %v724_v58 = vld [vmem:[%s1275_s7 + $0x10] sm:$0xff] }
  0x3f   :  { %545 = vmatpush.bf16.msrb.mxu1 %v1053_v59  ;;  %v723_v59 = vld [vmem:[%s1275_s7 + $0x8] sm:$0xff] }
  0x41   :  { %641 = vmatpush.bf16.msrb.mxu3 %v1062_v9 }
  0x42   :  { %533 = vmatpush.bf16.msrb.mxu0 %v1044_v63 }
  0x43   :  { %546 = vmatpush.bf16.msrb.mxu1 %v1052_v0 }
  0x45   :  { %534 = vmatmul.bf16.vlgmr.msrb.gmra.mxu0 %v167_v1  ;;  %642 = vmatpush.bf16.msrb.mxu3 %v1061_v12 }
  0x46   :  { %547 = vmatmul.bf16.vlgmr.msrb.gmra.mxu1 %v168_v2  ;;  %738 = vmatpush.msra.mxu0 %v737_v45 }
  0x48   :  { %739 = vmatpush.msra.mxu0 %v736_v46 }
  0x4a   :  { %740 = vmatpush.msra.mxu0 %v735_v47 }
  0x4c   :  { %741 = vmatpush.msra.mxu0 %v734_v48 }
  0x4e   :  { %742 = vmatpush.msra.mxu0 %v733_v49 }
  0x50   :  { %743 = vmatpush.msra.mxu0 %v732_v50 }
  0x52   :  { %744 = vmatpush.msra.mxu0 %v731_v51 }
  0x54   :  { %745 = vmatpush.msra.mxu0 %v730_v52 }
  0x56   :  { %746 = vmatpush.msra.mxu0 %v729_v53 }
  0x58   :  { %747 = vmatpush.msra.mxu0 %v728_v54 }
  0x5a   :  { %748 = vmatpush.msra.mxu0 %v727_v55 }
  0x5c   :  { %749 = vmatpush.msra.mxu0 %v726_v56 }
  0x5e   :  { %750 = vmatpush.msra.mxu0 %v725_v57 }
  0x60   :  { %751 = vmatpush.msra.mxu0 %v724_v58 }
  0x62   :  { %752 = vmatpush.msra.mxu0 %v723_v59 }
  0x64   :  { %753 = vmatpush.msra.mxu0 %v722_v60 }
  0xa2   :  { %v483_v10 = vpop.f32.mrf.mxu0 }
  0xa3   :  { %v496_v11 = vpop.f32.mrf.mxu1  ;;  %v484_v21 = vadd.f32 %v1076_v19, %v483_v10 }
  0xa5   :  { %v497_v24 = vadd.f32 %v496_v11, %v484_v21 }
  0xaa   :  { %v485_v13 = vpop.f32.mrf.mxu0  ;;  %v509_v16 = vpop.f32.mrf.mxu2 }
  0xab   :  { %v498_v14 = vpop.f32.mrf.mxu1  ;;  %v522_v17 = vpop.f32.mrf.mxu3  ;;  %v510_v25 = vadd.f32 %v509_v16, %v497_v24 }
  0xad   :  { %v523_v27 = vadd.f32 %v522_v17, %v510_v25 }
  0xb2   :  { %v511_v22 = vpop.f32.mrf.mxu2 }
  0xb3   :  { %v524_v23 = vpop.f32.mrf.mxu3 }
  0xba   :  { %v561_v26 = vpop.f32.mrf.mxu2 }
  0xc2   :  { %v535_v28 = vpop.f32.mrf.mxu0  ;;  %v563_v32 = vpop.f32.mrf.mxu2 }
  0xc3   :  { %v548_v29 = vpop.f32.mrf.mxu1  ;;  %v536_v30 = vadd.f32 %v535_v28, %v523_v27 }
  0xc5   :  { %v549_v31 = vadd.f32 %v548_v29, %v536_v30 }
  0xc7   :  { %v562_v33 = vadd.f32 %v561_v26, %v549_v31 }
  0xc9   :  { %v565_v34 = vmax.f32 %v562_v33, 0.0 }
  0xca   :  { %v537_v35 = vpop.f32.mrf.mxu0 }
  0xcb   :  { %v550_v36 = vpop.f32.mrf.mxu1  ;;  %v566_v37 = vpack.c.bf16 %v565_v34, %v565_v34 }
  0xcd   :  { %643 = vmatmul.bf16.vlgmr.msrb.gmra.mxu3 %v566_v37 }
 0x150   :  { %v644_v40 = vpop.f32.mrf.mxu3 }
 0x151   :  { %v645_v41 = vadd.f32 %v1077_v39, %v644_v40 }
 0x153   :  { %v648_v42 = vmax.f32 %v645_v41, 0.0 }
 0x155   :  { %v649_v43 = vpack.c.bf16 %v648_v42, %v648_v42 }
 0x157   :  { %1010 = vmatmul.msk.bf16.vlgmr.msra.gmra.mxu2 %vm686_vm1, %v649_v43 }
 0x158   :  { %v646_v44 = vpop.f32.mrf.mxu3 }
 0x1da   :  { %v699_v62 = vpop.f32.mrf.mxu2 }
 0x1db   :  { %v700_v63 = vadd.f32 %v1078_v61, %v699_v62 }
 0x1dd   :  { %v1011_v0 = vmul.f32 -1.442695, %v700_v63 }
 0x1df   :  { %1079 = vpow2.f32 %v1011_v0 }
 0x1e2   :  { %v701_v1 = vpop.f32.mrf.mxu2 }
 0x1e5   :  { %v1080_v2 = vpop.eup %1079 }
 0x1e6   :  { %v706_v3 = vadd.f32 1.0, %v1080_v2 }
 0x1e8   :  { %1081 = vrcp.f32 %v706_v3  ;;  %v718_v7 = vand.u32 2147483648, %v706_v3  ;;  %v716_v9 = vand.u32 2147483647, %v706_v3  ;;  %vm712_vm3 = vweird.f32 %v706_v3 }
 0x1ea   :  { %v719_v11 = vor.u32 1.1754944e-38, %v718_v7  ;;  %vm717_vm5 = vcmp.eq.f32.partialorder %v716_v9, 8.507059e+37 }
 0x1ee   :  { %v1082_v4 = vpop.eup %1081 }
 0x1ef   :  { %v708_v5 = vmul.f32 %v1082_v4, %v706_v3  ;;  %vm713_vm2 = vweird.f32 %v1082_v4 }
 0x1f0   :  { %vm714_vm4 = vmor %vm712_vm3, %vm713_vm2 }
 0x1f1   :  { %v709_v6 = vsub.f32 1.0, %v708_v5 }
 0x1f3   :  { %v710_v8 = vmul.f32 %v1082_v4, %v709_v6 }
 0x1f5   :  { %v711_v10 = vadd.f32 %v1082_v4, %v710_v8 }
 0x1f7   :  { %v715_v12 = vsel %vm714_vm4, %v1082_v4, %v711_v10 }
 0x1f8   :  { %v720_v13 = vsel %vm717_vm5, %v719_v11, %v715_v12 }
 0x1f9   :  { %754 = vmatmul.f32.vlgmr.msra.gmra.mxu0 %v720_v13 }
 0x276   :  { %v755_v14 = vpop.f32.mrf.mxu0 }
 0x277   :  { %759 = vst.msk [vmem:[%s1276_s8] sm:$0xff] %vm758_vm6, %v755_v14 }
 0x278   :  { %764 = vsyncpa [#allocation3], 1 }

</bundles_post_ra>
